<compile_context>
chip_gen: v7x
topology: tpu7x:2x2x1
jax: 0.10.0
libtpu: 0.0.40
codegen_flags: <defaults>
</compile_context>

<pallas_src>
import jax
import jax.numpy as jnp
from jax.experimental import pallas as pl
from jax.experimental.pallas import tpu as pltpu

_TK_MAX = 8192  # columns of the (8, M) slab handled per grid step (mult. of 128)


def _lane_dense_kernel(x_ref, o_ref):
    """x_ref: (8, TK) f32.  o_ref: (2, TK//16, 128) f32 (lane-dense slab)."""
    tk = x_ref.shape[1]
    # '+1' on the lane-dense (8, TK) layout, then transpose + flatten into a
    # lane-dense (TK//16, 128) slab (flat order == flat order of e's rows).
    y = (x_ref[...] + 1.0).T.reshape(tk // 16, 128)
    o_ref[0, :, :] = y   # first half of cat((c, c), dim=1)
    o_ref[1, :, :] = y   # second half (duplicate)


def _narrow_kernel(x_ref, o_ref):
    """Fallback: x_ref: (8, TK) f32.  o_ref: (2, TK, 8) f32."""
    y = (x_ref[...] + 1.0).T          # (TK, 8)
    o_ref[0, :, :] = y
    o_ref[1, :, :] = y


def _pallas_forward(b2d, m, tk, lane_dense):
    grid = (pl.cdiv(m, tk),)
    params = pltpu.CompilerParams(
        dimension_semantics=("parallel",),
        vmem_limit_bytes=32 * 1024 * 1024,
    )
    # Pure memory movement: read 8*m*4 B, write 2*m*8*4 B; flops = the adds.
    cost = pl.CostEstimate(flops=8 * m, transcendentals=0, bytes_accessed=96 * m)
    in_specs = [pl.BlockSpec((8, tk), lambda i: (0, i))]

    if lane_dense:
        out = pl.pallas_call(
            _lane_dense_kernel,
            out_shape=jax.ShapeDtypeStruct((2, m // 16, 128), b2d.dtype),
            grid=grid,
            in_specs=in_specs,
            out_specs=pl.BlockSpec((2, tk // 16, 128), lambda i: (0, i, 0)),
            compiler_params=params,
            cost_estimate=cost,
        )(b2d)
    else:
        out = pl.pallas_call(
            _narrow_kernel,
            out_shape=jax.ShapeDtypeStruct((2, m, 8), b2d.dtype),
            grid=grid,
            in_specs=in_specs,
            out_specs=pl.BlockSpec((2, tk, 8), lambda i: (0, i, 0)),
            compiler_params=params,
            cost_estimate=cost,
        )(b2d)

    # Row-major order of either slab equals the row-major order of
    # e = cat((c, c), 1) + 1, so this reshape is layout plumbing only.
    return out.reshape(1, 2 * m, 8)


def net_reshape_forward(x):
    """x: (2, C, H, W) float32 -> (1, 2 * C*H*W // 8, 8) float32."""
    assert x.ndim == 4 and x.shape[0] == 2
    a = x[0].reshape(x[1].shape)          # reshape_as(input[1]) — identity here
    n = a.size
    assert n % 8 == 0, "numel of input[0] must be divisible by 8"
    m = n // 8
    b2d = a.reshape(8, m)                 # b = reshape(a, (1, 8, -1)) sans lead dim

    tk = m if m <= _TK_MAX else _TK_MAX   # M-axis tile (multiple of 128 when tiled)

    if m % 16 == 0:                       # lane-dense slab needs 16 cols per 128-lane row
        try:
            return _pallas_forward(b2d, m, tk, lane_dense=True)
        except Exception:
            # Mosaic on this toolchain could not lower the in-register
            # (TK,8)->(TK//16,128) relayout; use the narrow-store fallback.
            pass
    return _pallas_forward(b2d, m, tk, lane_dense=False)


if __name__ == "__main__":
    key = jax.random.PRNGKey(0)
    x = jax.random.normal(key, (2, 4, 16, 16), dtype=jnp.float32)

    out = jax.block_until_ready(net_reshape_forward(x))

    # pure-JAX reference of the PyTorch forward
    a_ref = x[0].reshape(x[1].shape)
    b_ref = a_ref.reshape(1, 8, -1)
    c_ref = jnp.transpose(b_ref, (0, 2, 1))
    d_ref = jnp.concatenate([c_ref, c_ref], axis=1)
    e_ref = d_ref + 1.0

    assert out.shape == e_ref.shape == (1, 256, 8), out.shape
    assert out.dtype == jnp.float32
    assert jnp.allclose(out, e_ref), "mismatch vs reference"
    print("KERNEL_OK")
</pallas_src>

<mosaic_0001>
module attributes {stable_mosaic.version = 11 : i64} {
  func.func @_lane_dense_kernel(%arg0: i32, %arg1: memref<8x128xf32, #tpu.memory_space<vmem>>, %arg2: memref<2x8x128xf32, #tpu.memory_space<vmem>>) attributes {dimension_semantics = [#tpu.dimension_semantics<parallel>], iteration_bounds = array<i64: 1>, scalar_prefetch = 0 : i64, scratch_operands = 0 : i64, tpu.core_type = #tpu.core_type<tc>, window_params = [{transform_indices = @transform_0, window_bounds = array<i64: 8, 128>}, {transform_indices = @transform_1, window_bounds = array<i64: 2, 8, 128>}]} {
    %c0 = arith.constant 0 : index
    %c0_0 = arith.constant 0 : index
    %0 = vector.load %arg1[%c0, %c0_0] : memref<8x128xf32, #tpu.memory_space<vmem>>, vector<8x128xf32>
    %cst = arith.constant 1.000000e+00 : f32
    %1 = vector.broadcast %cst : f32 to vector<8x128xf32>
    %2 = arith.addf %0, %1 : vector<8x128xf32>
    %3 = tpu.transpose %2, [1, 0] : vector<8x128xf32> -> vector<128x8xf32>
    %4 = vector.shape_cast %3 : vector<128x8xf32> to vector<8x128xf32>
    %c0_1 = arith.constant 0 : index
    %c0_2 = arith.constant 0 : index
    %c0_3 = arith.constant 0 : index
    %5 = vector.load %arg2[%c0_1, %c0_2, %c0_3] : memref<2x8x128xf32, #tpu.memory_space<vmem>>, vector<1x8x128xf32>
    %6 = vector.shape_cast %5 : vector<1x8x128xf32> to vector<8x128xf32>
    %7 = vector.shape_cast %4 : vector<8x128xf32> to vector<1x8x128xf32>
    tpu.vector_store %arg2[%c0_1, %c0_2, %c0_3], %7 {strides = array<i32>} : memref<2x8x128xf32, #tpu.memory_space<vmem>>, vector<1x8x128xf32>,
    %c1 = arith.constant 1 : index
    %c0_4 = arith.constant 0 : index
    %c0_5 = arith.constant 0 : index
    %8 = vector.load %arg2[%c1, %c0_4, %c0_5] : memref<2x8x128xf32, #tpu.memory_space<vmem>>, vector<1x8x128xf32>
    %9 = vector.shape_cast %8 : vector<1x8x128xf32> to vector<8x128xf32>
    %10 = vector.shape_cast %4 : vector<8x128xf32> to vector<1x8x128xf32>
    tpu.vector_store %arg2[%c1, %c0_4, %c0_5], %10 {strides = array<i32>} : memref<2x8x128xf32, #tpu.memory_space<vmem>>, vector<1x8x128xf32>,
    return
  }
  func.func @transform_0(%arg0: i32) -> (i32, i32) {
    %c0_i32 = arith.constant 0 : i32
    %c0_i32_0 = arith.constant 0 : i32
    return %c0_i32, %arg0 : i32, i32
  }
  func.func @transform_1(%arg0: i32) -> (i32, i32, i32) {
    %c0_i32 = arith.constant 0 : i32
    %c0_i32_0 = arith.constant 0 : i32
    %c0_i32_1 = arith.constant 0 : i32
    return %c0_i32, %arg0, %c0_i32_0 : i32, i32, i32
  }
}

module attributes {stable_mosaic.version = 11 : i64} {
  func.func @_narrow_kernel(%arg0: i32, %arg1: memref<8x128xf32, #tpu.memory_space<vmem>>, %arg2: memref<2x128x8xf32, #tpu.memory_space<vmem>>) attributes {dimension_semantics = [#tpu.dimension_semantics<parallel>], iteration_bounds = array<i64: 1>, scalar_prefetch = 0 : i64, scratch_operands = 0 : i64, tpu.core_type = #tpu.core_type<tc>, window_params = [{transform_indices = @transform_0, window_bounds = array<i64: 8, 128>}, {transform_indices = @transform_1, window_bounds = array<i64: 2, 128, 8>}]} {
    %c0 = arith.constant 0 : index
    %c0_0 = arith.constant 0 : index
    %0 = vector.load %arg1[%c0, %c0_0] : memref<8x128xf32, #tpu.memory_space<vmem>>, vector<8x128xf32>
    %cst = arith.constant 1.000000e+00 : f32
    %1 = vector.broadcast %cst : f32 to vector<8x128xf32>
    %2 = arith.addf %0, %1 : vector<8x128xf32>
    %3 = tpu.transpose %2, [1, 0] : vector<8x128xf32> -> vector<128x8xf32>
    %c0_1 = arith.constant 0 : index
    %c0_2 = arith.constant 0 : index
    %c0_3 = arith.constant 0 : index
    %4 = vector.load %arg2[%c0_1, %c0_2, %c0_3] : memref<2x128x8xf32, #tpu.memory_space<vmem>>, vector<1x128x8xf32>
    %5 = vector.shape_cast %4 : vector<1x128x8xf32> to vector<128x8xf32>
    %6 = vector.shape_cast %3 : vector<128x8xf32> to vector<1x128x8xf32>
    tpu.vector_store %arg2[%c0_1, %c0_2, %c0_3], %6 {strides = array<i32>} : memref<2x128x8xf32, #tpu.memory_space<vmem>>, vector<1x128x8xf32>,
    %c1 = arith.constant 1 : index
    %c0_4 = arith.constant 0 : index
    %c0_5 = arith.constant 0 : index
    %7 = vector.load %arg2[%c1, %c0_4, %c0_5] : memref<2x128x8xf32, #tpu.memory_space<vmem>>, vector<1x128x8xf32>
    %8 = vector.shape_cast %7 : vector<1x128x8xf32> to vector<128x8xf32>
    %9 = vector.shape_cast %3 : vector<128x8xf32> to vector<1x128x8xf32>
    tpu.vector_store %arg2[%c1, %c0_4, %c0_5], %9 {strides = array<i32>} : memref<2x128x8xf32, #tpu.memory_space<vmem>>, vector<1x128x8xf32>,
    return
  }
  func.func @transform_0(%arg0: i32) -> (i32, i32) {
    %c0_i32 = arith.constant 0 : i32
    %c0_i32_0 = arith.constant 0 : i32
    return %c0_i32, %arg0 : i32, i32
  }
  func.func @transform_1(%arg0: i32) -> (i32, i32, i32) {
    %c0_i32 = arith.constant 0 : i32
    %c0_i32_0 = arith.constant 0 : i32
    %c0_i32_1 = arith.constant 0 : i32
    return %c0_i32, %arg0, %c0_i32_0 : i32, i32, i32
  }
}

</mosaic_0001>

<bundles_post_ra>
// kernel: tpu_custom_call.1
= control target key start
LH: loop header
LB: loop body
LE: loop exit
PB: predicated region body
PF: predicated region fallthrough
CT: control target
= control target key end

     0   :  { %6 = vsyncpa [#allocation3], 0  ;;  %s135_s6 = smov [#allocation2]   ;;  %s286_s0 = inlined_call_operand.hbm [shape: f32[8,128], index: 0, kind: input, shape index: {}]   ;;  %s287_s1 = inlined_call_operand.vmem [shape: f32[2,128,8], index: 1, kind: output, shape index: {}]  }
   0x1   :  { %s13_s7 = sshll.u32 %s135_s6, 4  ;;  %s111_s10 = scalar_lea.hbm %s286_s0, 128  ;;  %s14_s7 = int_to_ptr.vmem [resolvable:$true] %s13_s7 }
   0x2   :  { %p112_p0 = scmp.ne.s32.totalorder %s286_s0, %s111_s10  ;;  %p115_p1 = scmp.lt.u32.totalorder %s111_s10, %s286_s0 }
   0x4   :  { %p117_p2 = pnand %p115_p1, %p112_p0 }
   0x6   :  { %120 = shalt.err (!%p117_p2)
}
   0x7   :  { %s121_s15 = scalar_lea.vmem %s14_s7, 128  ;;  %p126_p4 = scmp.lt.s32.totalorder %s14_s7, %s14_s7 }
   0x8   :  { %p122_p3 = scmp.ne.s32.totalorder %s14_s7, %s121_s15  ;;  %p127_p5 = scmp.lt.s32.totalorder %s121_s15, %s121_s15 }
   0xa   :  { %p128_p6 = por %p127_p5, %p126_p4 }
   0xc   :  { %p129_p7 = pnand %p128_p6, %p122_p3 }
   0xe   :  { %132 = shalt.err (!%p129_p7)
}
   0xf   :  { %16 = dma.hbm_to_vmem [thread:$0]  %s286_s0, 128, %s14_s7, [#allocation3]  }
  0x10   :  { %133 = dma.done.wait [#allocation3], 128  }
  0x11   :  { %134 = vsyncadd [#allocation3], 4294967168  ;;  %v20_v0 = vld [vmem:[#allocation2] sm:$0xff]  ;;  %vm54_vm0 = vcmask 64512  }
  0x12   :  { %v21_v1 = vadd.f32 1.0, %v20_v0 }
  0x14   :  { %22 = vxpose.xlu0.b32.start.end [1/1] (short) %v21_v1, 128 }
  0x94   :  { %v38_v2 = vpop.trf.xlu0 }
  0x95   :  { %55 = vst.msk [vmem:[%s287_s1] sm:$0xff] %vm54_vm0, %v38_v2  ;;  %93 = vst.msk [vmem:[%s287_s1 + $0x80] sm:$0xff] %vm54_vm0, %v38_v2 }
  0x98   :  { %v39_v3 = vpop.trf.xlu0 }
  0x99   :  { %56 = vst.msk [vmem:[%s287_s1 + $0x8] sm:$0xff] %vm54_vm0, %v39_v3  ;;  %94 = vst.msk [vmem:[%s287_s1 + $0x88] sm:$0xff] %vm54_vm0, %v39_v3 }
  0x9c   :  { %v40_v4 = vpop.trf.xlu0 }
  0x9d   :  { %57 = vst.msk [vmem:[%s287_s1 + $0x10] sm:$0xff] %vm54_vm0, %v40_v4  ;;  %95 = vst.msk [vmem:[%s287_s1 + $0x90] sm:$0xff] %vm54_vm0, %v40_v4 }
  0xa0   :  { %v41_v5 = vpop.trf.xlu0 }
  0xa1   :  { %58 = vst.msk [vmem:[%s287_s1 + $0x18] sm:$0xff] %vm54_vm0, %v41_v5  ;;  %96 = vst.msk [vmem:[%s287_s1 + $0x98] sm:$0xff] %vm54_vm0, %v41_v5 }
  0xa4   :  { %v42_v6 = vpop.trf.xlu0 }
  0xa5   :  { %59 = vst.msk [vmem:[%s287_s1 + $0x20] sm:$0xff] %vm54_vm0, %v42_v6  ;;  %97 = vst.msk [vmem:[%s287_s1 + $0xa0] sm:$0xff] %vm54_vm0, %v42_v6 }
  0xa8   :  { %v43_v7 = vpop.trf.xlu0 }
  0xa9   :  { %60 = vst.msk [vmem:[%s287_s1 + $0x28] sm:$0xff] %vm54_vm0, %v43_v7  ;;  %98 = vst.msk [vmem:[%s287_s1 + $0xa8] sm:$0xff] %vm54_vm0, %v43_v7 }
  0xac   :  { %v44_v8 = vpop.trf.xlu0 }
  0xad   :  { %61 = vst.msk [vmem:[%s287_s1 + $0x30] sm:$0xff] %vm54_vm0, %v44_v8  ;;  %99 = vst.msk [vmem:[%s287_s1 + $0xb0] sm:$0xff] %vm54_vm0, %v44_v8 }
  0xb0   :  { %v45_v9 = vpop.trf.xlu0 }
  0xb1   :  { %62 = vst.msk [vmem:[%s287_s1 + $0x38] sm:$0xff] %vm54_vm0, %v45_v9  ;;  %100 = vst.msk [vmem:[%s287_s1 + $0xb8] sm:$0xff] %vm54_vm0, %v45_v9 }
  0xb4   :  { %v46_v10 = vpop.trf.xlu0 }
  0xb5   :  { %63 = vst.msk [vmem:[%s287_s1 + $0x40] sm:$0xff] %vm54_vm0, %v46_v10  ;;  %101 = vst.msk [vmem:[%s287_s1 + $0xc0] sm:$0xff] %vm54_vm0, %v46_v10 }
  0xb8   :  { %v47_v11 = vpop.trf.xlu0 }
  0xb9   :  { %64 = vst.msk [vmem:[%s287_s1 + $0x48] sm:$0xff] %vm54_vm0, %v47_v11  ;;  %102 = vst.msk [vmem:[%s287_s1 + $0xc8] sm:$0xff] %vm54_vm0, %v47_v11 }
  0xbc   :  { %v48_v12 = vpop.trf.xlu0 }
  0xbd   :  { %65 = vst.msk [vmem:[%s287_s1 + $0x50] sm:$0xff] %vm54_vm0, %v48_v12  ;;  %103 = vst.msk [vmem:[%s287_s1 + $0xd0] sm:$0xff] %vm54_vm0, %v48_v12 }
  0xc0   :  { %v49_v13 = vpop.trf.xlu0 }
  0xc1   :  { %66 = vst.msk [vmem:[%s287_s1 + $0x58] sm:$0xff] %vm54_vm0, %v49_v13  ;;  %104 = vst.msk [vmem:[%s287_s1 + $0xd8] sm:$0xff] %vm54_vm0, %v49_v13 }
  0xc4   :  { %v50_v14 = vpop.trf.xlu0 }
  0xc5   :  { %67 = vst.msk [vmem:[%s287_s1 + $0x60] sm:$0xff] %vm54_vm0, %v50_v14  ;;  %105 = vst.msk [vmem:[%s287_s1 + $0xe0] sm:$0xff] %vm54_vm0, %v50_v14 }
  0xc8   :  { %v51_v15 = vpop.trf.xlu0 }
  0xc9   :  { %68 = vst.msk [vmem:[%s287_s1 + $0x68] sm:$0xff] %vm54_vm0, %v51_v15  ;;  %106 = vst.msk [vmem:[%s287_s1 + $0xe8] sm:$0xff] %vm54_vm0, %v51_v15 }
  0xcc   :  { %v52_v16 = vpop.trf.xlu0 }
  0xcd   :  { %69 = vst.msk [vmem:[%s287_s1 + $0x70] sm:$0xff] %vm54_vm0, %v52_v16  ;;  %107 = vst.msk [vmem:[%s287_s1 + $0xf0] sm:$0xff] %vm54_vm0, %v52_v16 }
  0xd0   :  { %v53_v17 = vpop.trf.xlu0 }
  0xd1   :  { %70 = vst.msk [vmem:[%s287_s1 + $0x78] sm:$0xff] %vm54_vm0, %v53_v17  ;;  %108 = vst.msk [vmem:[%s287_s1 + $0xf8] sm:$0xff] %vm54_vm0, %v53_v17 }
  0xd2   :  { %92 = vsyncpa [#allocation3], 1 }

</bundles_post_ra>
